<compile_context>
chip_gen: v7x
topology: tpu7x:2x2x1
jax: 0.10.0
libtpu: 0.0.40
codegen_flags: <defaults>
</compile_context>

<pallas_src>
import jax
import jax.numpy as jnp
from jax.experimental import pallas as pl
from jax.experimental.pallas import tpu as pltpu


# ----------------------------------------------------------------------------
# use_conv=False : AvgPool2d(down_rate, down_rate)
# ----------------------------------------------------------------------------
def _make_pool_kernel(inv_area):
    def kernel(x_ref, p_ref, o_ref):
        # x_ref: (tm, s*Ws) rows = the s input rows of one pooled output row
        # p_ref: (s*Ws, Wd)  0/1 window-selection matrix (resident, tiny)
        acc = jnp.dot(x_ref[...], p_ref[...], preferred_element_type=jnp.float32)
        o_ref[...] = (acc * inv_area).astype(o_ref.dtype)
    return kernel


def downsample_avgpool(x, down_rate=2):
    # layout: NCHW.  Floor mode (remainder rows/cols dropped), like AvgPool2d default.
    N, C, H, W = x.shape
    s = int(down_rate)
    Hd, Wd = H // s, W // s
    assert Hd > 0 and Wd > 0
    x = x[:, :, :Hd * s, :Wd * s]                    # drop remainder (no-op when divisible)
    Ws = Wd * s

    # Free reshape: row r=(n,c,i) holds the s input rows h = i*s+k concatenated along W.
    R = N * C * Hd
    a = x.reshape(R, s * Ws)

    # Selection matrix P[(k*Ws + w), j] = 1  iff  w // s == j  (exact 0/1 weights).
    pw = (jnp.arange(Ws)[:, None] // s == jnp.arange(Wd)[None, :])
    p = jnp.tile(pw, (s, 1)).astype(x.dtype)         # (s*Ws, Wd)

    tm = R if R <= 512 else 512                      # big M tile (multiple of 8 when tiled)
    grid = (pl.cdiv(R, tm),)

    out = pl.pallas_call(
        _make_pool_kernel(1.0 / float(s * s)),
        out_shape=jax.ShapeDtypeStruct((R, Wd), x.dtype),
        grid=grid,
        in_specs=[
            pl.BlockSpec((tm, s * Ws), lambda i: (i, 0)),
            pl.BlockSpec((s * Ws, Wd), lambda i: (0, 0)),
        ],
        out_specs=pl.BlockSpec((tm, Wd), lambda i: (i, 0)),
        compiler_params=pltpu.CompilerParams(dimension_semantics=("parallel",)),
    )(a, p)

    return out.reshape(N, C, Hd, Wd)                 # free reshape


# ----------------------------------------------------------------------------
# use_conv=True : Conv2d(k=3, stride=down_rate, padding=1, padding_mode='zeros')
# ----------------------------------------------------------------------------
def _conv_kernel(w_ref, cols_ref, b_ref, o_ref):
    # w_ref: (Cout, K)   cols_ref: (1, K, tl)   b_ref: (Cout, 1)   o_ref: (1, Cout, tl)
    acc = jnp.dot(w_ref[...], cols_ref[0], preferred_element_type=jnp.float32)
    o_ref[0] = (acc + b_ref[...]).astype(o_ref.dtype)


def downsample_conv(x, w, b, down_rate=2, padding=1):
    # layout: x NCHW, w OIHW, b (Cout,)
    N, C, H, W = x.shape
    Cout, Cin, KH, KW = w.shape
    assert Cin == C
    s = int(down_rate)
    Ho = (H + 2 * padding - KH) // s + 1
    Wo = (W + 2 * padding - KW) // s + 1
    L = Ho * Wo
    K = C * KH * KW

    # TODO(synk): padding_mode other than 'zeros' not implemented.
    xp = jnp.pad(x, ((0, 0), (0, 0), (padding, padding), (padding, padding)))

    # im2col, patch order (c, kh, kw) matches w.reshape(Cout, C*KH*KW); built with
    # strided slices + one stack only (no HBM transposes).
    # TODO(synk): im2col is still materialized by XLA glue; a fully fused in-kernel
    #             gather over (kh,kw) taps would remove the extra HBM pass.
    taps = [xp[:, :, kh:kh + s * (Ho - 1) + 1:s, kw:kw + s * (Wo - 1) + 1:s]
            for kh in range(KH) for kw in range(KW)]
    cols = jnp.stack(taps, axis=2).reshape(N, K, L)            # (N, C*9, Ho*Wo)

    wmat = w.reshape(Cout, K).astype(x.dtype)                  # (Cout, K) — resident, tiny
    bcol = b.reshape(Cout, 1).astype(jnp.float32)              # fused bias, broadcast over lanes

    tl = L if L <= 1024 else 1024                              # lane-dense output tile (mult of 128 when tiled)
    grid = (N, pl.cdiv(L, tl))

    out = pl.pallas_call(
        _conv_kernel,
        out_shape=jax.ShapeDtypeStruct((N, Cout, L), x.dtype),
        grid=grid,
        in_specs=[
            pl.BlockSpec((Cout, K), lambda n, j: (0, 0)),
            pl.BlockSpec((1, K, tl), lambda n, j: (n, 0, j)),
            pl.BlockSpec((Cout, 1), lambda n, j: (0, 0)),
        ],
        out_specs=pl.BlockSpec((1, Cout, tl), lambda n, j: (n, 0, j)),
        compiler_params=pltpu.CompilerParams(
            dimension_semantics=("parallel", "parallel")),
    )(wmat, cols, bcol)

    return out.reshape(N, Cout, Ho, Wo)                        # free reshape (no transpose)


# ----------------------------------------------------------------------------
if __name__ == "__main__":
    key = jax.random.PRNGKey(0)
    kx, kw, kb = jax.random.split(key, 3)

    N, C, H, W = 2, 4, 16, 16
    down_rate = 2
    x = jax.random.normal(kx, (N, C, H, W), jnp.float32)

    # --- path 1: Downsample(n_channels=C, use_conv=False, dims=2) ---
    y_pool = jax.block_until_ready(downsample_avgpool(x, down_rate))
    ref_pool = x.reshape(N, C, H // down_rate, down_rate,
                         W // down_rate, down_rate).mean(axis=(3, 5))
    assert y_pool.shape == (N, C, H // 2, W // 2)
    assert jnp.allclose(y_pool, ref_pool, rtol=1e-5, atol=1e-5)

    # --- path 2: Downsample(n_channels=C, use_conv=True, dims=2, n_out_channels=8) ---
    Cout = 8
    w = jax.random.normal(kw, (Cout, C, 3, 3), jnp.float32) * 0.1
    b = jax.random.normal(kb, (Cout,), jnp.float32) * 0.1
    y_conv = jax.block_until_ready(downsample_conv(x, w, b, down_rate, padding=1))
    ref_conv = jax.lax.conv_general_dilated(
        x, w, window_strides=(down_rate, down_rate), padding=((1, 1), (1, 1)),
        dimension_numbers=("NCHW", "OIHW", "NCHW")) + b[None, :, None, None]
    assert y_conv.shape == (N, Cout, H // 2, W // 2)
    assert jnp.allclose(y_conv, ref_conv, rtol=1e-4, atol=1e-4)

    # TODO(synk): dims=1/3 module variants not exercised (same matmul recipe applies).
    print("KERNEL_OK")
</pallas_src>

<mosaic_0001>
module attributes {stable_mosaic.version = 11 : i64} {
  func.func @kernel(%arg0: i32, %arg1: memref<64x32xf32, #tpu.memory_space<vmem>>, %arg2: memref<32x8xf32, #tpu.memory_space<vmem>>, %arg3: memref<64x8xf32, #tpu.memory_space<vmem>>) attributes {dimension_semantics = [#tpu.dimension_semantics<parallel>], iteration_bounds = array<i64: 1>, scalar_prefetch = 0 : i64, scratch_operands = 0 : i64, tpu.core_type = #tpu.core_type<tc>, window_params = [{transform_indices = @transform_0, window_bounds = array<i64: 64, 32>}, {pipeline_mode = #tpu.pipeline_mode<synchronous>, transform_indices = @transform_1, window_bounds = array<i64: 32, 8>}, {transform_indices = @transform_2, window_bounds = array<i64: 64, 8>}]} {
    %c0 = arith.constant 0 : index
    %c0_0 = arith.constant 0 : index
    %0 = vector.load %arg1[%c0, %c0_0] : memref<64x32xf32, #tpu.memory_space<vmem>>, vector<64x32xf32>
    %c0_1 = arith.constant 0 : index
    %c0_2 = arith.constant 0 : index
    %1 = vector.load %arg2[%c0_1, %c0_2] : memref<32x8xf32, #tpu.memory_space<vmem>>, vector<32x8xf32>
    %cst = arith.constant dense<0.000000e+00> : vector<64x8xf32>
    %2 = tpu.matmul %0, %1, %cst {dimension_numbers = #tpu.dot_dimension_numbers<[1], [0], [0], [1], [0, 0, 1, 1], [], []>} : vector<64x32xf32>, vector<32x8xf32>, vector<64x8xf32> -> vector<64x8xf32>
    %cst_3 = arith.constant 2.500000e-01 : f32
    %3 = vector.broadcast %cst_3 : f32 to vector<64x8xf32>
    %4 = arith.mulf %2, %3 : vector<64x8xf32>
    %c0_4 = arith.constant 0 : index
    %c0_5 = arith.constant 0 : index
    %5 = vector.load %arg3[%c0_4, %c0_5] : memref<64x8xf32, #tpu.memory_space<vmem>>, vector<64x8xf32>
    tpu.vector_store %arg3[%c0_4, %c0_5], %4 {strides = array<i32>} : memref<64x8xf32, #tpu.memory_space<vmem>>, vector<64x8xf32>,
    return
  }
  func.func @transform_0(%arg0: i32) -> (i32, i32) {
    %c0_i32 = arith.constant 0 : i32
    %c0_i32_0 = arith.constant 0 : i32
    return %arg0, %c0_i32 : i32, i32
  }
  func.func @transform_1(%arg0: i32) -> (i32, i32) {
    %c0_i32 = arith.constant 0 : i32
    %c0_i32_0 = arith.constant 0 : i32
    %c0_i32_1 = arith.constant 0 : i32
    return %c0_i32, %c0_i32_0 : i32, i32
  }
  func.func @transform_2(%arg0: i32) -> (i32, i32) {
    %c0_i32 = arith.constant 0 : i32
    %c0_i32_0 = arith.constant 0 : i32
    return %arg0, %c0_i32 : i32, i32
  }
}

</mosaic_0001>

<bundles_post_ra>
// kernel: tpu_custom_call.1
= control target key start
LH: loop header
LB: loop body
LE: loop exit
PB: predicated region body
PF: predicated region fallthrough
CT: control target
= control target key end

     0   :  { %vm23_vm0 = vcmask 261120   ;;  %vm161_vm1 = vcmask 64512   ;;  %s317_s1 = inlined_call_operand.vmem [shape: f32[32,8], index: 1, kind: input, shape index: {}]   ;;  %s318_s0 = inlined_call_operand.vmem [shape: f32[64,32], index: 0, kind: input, shape index: {}]   ;;  %s319_s2 = inlined_call_operand.vmem [shape: f32[64,8], index: 2, kind: output, shape index: {}]  }
   0x1   :  { %v19_v0 = vld [vmem:[%s317_s1] sm:$0xff]  ;;  %v20_v1 = vld [vmem:[%s317_s1 + $0x8] sm:$0xff]  ;;  %v21_v2 = vld [vmem:[%s317_s1 + $0x10] sm:$0xff] }
   0x2   :  { %v214_v3 = vpack.c.bf16 %v20_v1, %v19_v0  ;;  %v22_v4 = vld [vmem:[%s317_s1 + $0x18] sm:$0xff]  ;;  %v11_v5 = vld [vmem:[%s318_s0] sm:$0xff]  ;;  %v12_v8 = vld [vmem:[%s318_s0 + $0x8] sm:$0xff] }
   0x3   :  { %v15_v6 = vld [vmem:[%s318_s0 + $0x20] sm:$0xff]  ;;  %v218_v7 = vpack.c.bf16 %v22_v4, %v21_v2  ;;  %202 = vmatprep.mubr.msk.f32.mxu0 %vm23_vm0, %v11_v5  ;;  %v16_v9 = vld [vmem:[%s318_s0 + $0x28] sm:$0xff]  ;;  %v13_v10 = vld [vmem:[%s318_s0 + $0x10] sm:$0xff] }
   0x4   :  { %208 = vmatprep.mubr.msk.f32.mxu1 %vm23_vm0, %v15_v6  ;;  %215 = vmatprep.subr.bf16.mxu0 %v214_v3  ;;  %v17_v11 = vld [vmem:[%s318_s0 + $0x30] sm:$0xff]  ;;  %v14_v12 = vld [vmem:[%s318_s0 + $0x18] sm:$0xff] }
   0x5   :  { %222 = vmatprep.subr.bf16.mxu1 %v214_v3  ;;  %217 = vmatpush3.bf16.msra.mxu0 %v214_v3  ;;  %v18_v13 = vld [vmem:[%s318_s0 + $0x38] sm:$0xff] }
   0x6   :  { %224 = vmatpush3.bf16.msra.mxu1 %v214_v3  ;;  %219 = vmatprep.subr.bf16.mxu0 %v218_v7 }
   0x7   :  { %223 = vmatprep.subr.bf16.mxu1 %v218_v7 }
   0x9   :  { %221 = vmatpush3.bf16.msra.mxu0 %v218_v7 }
   0xa   :  { %225 = vmatpush3.bf16.msra.mxu1 %v218_v7 }
   0xc   :  { %203 = vmatmul.mubr.msk.f32.vlgmr.msra.gmra.mrb[0].mxu0 %vm23_vm0, %v12_v8 }
   0xd   :  { %209 = vmatmul.mubr.msk.f32.vlgmr.msra.gmra.mrb[0].mxu1 %vm23_vm0, %v16_v9  ;;  %205 = vmatprep.mubr.msk.f32.mxu0 %vm23_vm0, %v13_v10 }
   0xe   :  { %211 = vmatprep.mubr.msk.f32.mxu1 %vm23_vm0, %v17_v11 }
  0x10   :  { %206 = vmatmul.mubr.msk.f32.gmra.mrb[2].mxu0 %vm23_vm0, %v14_v12 }
  0x11   :  { %212 = vmatmul.mubr.msk.f32.gmra.mrb[2].mxu1 %vm23_vm0, %v18_v13 }
  0xdf   :  { %v204_v14 = vpop.f32.mrb[0].mxu0 }
  0xe0   :  { %v210_v15 = vpop.f32.mrb[0].mxu1  ;;  %v154_v16 = vmul.f32 0.25, %v204_v14  ;;  %v114_v18 = vpop.f32.mrb[1].mxu0 }
  0xe1   :  { %v158_v17 = vmul.f32 0.25, %v210_v15  ;;  %v134_v19 = vpop.f32.mrb[1].mxu1  ;;  %v153_v20 = vmul.f32 0.25, %v114_v18 }
  0xe2   :  { %v157_v21 = vmul.f32 0.25, %v134_v19  ;;  %163 = vst.msk [vmem:[%s319_s2 + $0x8] sm:$0xff] %vm161_vm1, %v154_v16 }
  0xe3   :  { %167 = vst.msk [vmem:[%s319_s2 + $0x28] sm:$0xff] %vm161_vm1, %v158_v17  ;;  %162 = vst.msk [vmem:[%s319_s2] sm:$0xff] %vm161_vm1, %v153_v20  ;;  %v207_v22 = vpop.f32.mrb[2].mxu0 }
  0xe4   :  { %166 = vst.msk [vmem:[%s319_s2 + $0x20] sm:$0xff] %vm161_vm1, %v157_v21  ;;  %v213_v23 = vpop.f32.mrb[2].mxu1  ;;  %v156_v24 = vmul.f32 0.25, %v207_v22  ;;  %v124_v26 = vpop.f32.mrb[3].mxu0 }
  0xe5   :  { %v160_v25 = vmul.f32 0.25, %v213_v23  ;;  %v144_v27 = vpop.f32.mrb[3].mxu1  ;;  %v155_v28 = vmul.f32 0.25, %v124_v26 }
  0xe6   :  { %v159_v29 = vmul.f32 0.25, %v144_v27  ;;  %165 = vst.msk [vmem:[%s319_s2 + $0x18] sm:$0xff] %vm161_vm1, %v156_v24 }
  0xe7   :  { %169 = vst.msk [vmem:[%s319_s2 + $0x38] sm:$0xff] %vm161_vm1, %v160_v25  ;;  %164 = vst.msk [vmem:[%s319_s2 + $0x10] sm:$0xff] %vm161_vm1, %v155_v28 }
  0xe8   :  { %168 = vst.msk [vmem:[%s319_s2 + $0x30] sm:$0xff] %vm161_vm1, %v159_v29 }

</bundles_post_ra>
